<compile_context>
chip_gen: v7x
topology: tpu7x:2x2x1
jax: 0.10.0
libtpu: 0.0.40
codegen_flags: <defaults>
</compile_context>

<pallas_src>
import functools

import jax
import jax.numpy as jnp
from jax.experimental import pallas as pl
from jax.experimental.pallas import tpu as pltpu


_LANE = 128


# ----------------------------- Pallas kernel ------------------------------ #
def _basenet_kernel(x_ref, m_ref, w1_ref, b1_ref, w2_ref, b2_ref, o_ref):
    # x_ref : (TM, D)  tile of flattened instances (rows -> sublanes, feat -> lanes)
    # m_ref : (1, TM)  lane-dense mask row for this tile
    # w1_ref: (D, H), b1_ref: (1, H), w2_ref: (1, H), b2_ref: (1, 1)
    # o_ref : (1, TM)  lane-dense output row
    # First Linear + ReLU on the MXU; accumulate in f32 even when x/W1 stream as bf16.
    h = jnp.dot(x_ref[...], w1_ref[...], preferred_element_type=jnp.float32)
    h = jnp.maximum(h + b1_ref[...], 0.0)                       # (TM, H) f32

    # Second Linear has out_features=1: compute it as (1,H) @ (TM,H)^T so the
    # result is a lane-dense (1, TM) row (q.kT contraction pattern).
    # NOTE(v5e): this M=1 matmul uses as many MXU tile-passes as the main matmul
    # while doing 1/D of the FLOPs; it is hidden under the HBM bound on v6e/v7x.
    # If H grows large on v5e, switch to a VPU broadcast-multiply + lane reduce.
    y_row = jax.lax.dot_general(
        w2_ref[...].astype(jnp.float32), h,
        dimension_numbers=(((1,), (1,)), ((), ())),
        preferred_element_type=jnp.float32,
    ) + b2_ref[...]                                             # (1, TM)

    y_row = m_ref[...] * y_row                                  # x = m * main_net(x)
    o_ref[...] = jax.nn.sigmoid(y_row).astype(o_ref.dtype)      # Sigmoid


# --------------------------- static tile planning --------------------------- #
def _round_down_lane(v):
    return max(_LANE, (int(v) // _LANE) * _LANE)


def _plan_tiles(rows, d, hid, x_itemsize, tile_m=None):
    """Pick a lane-aligned row tile sized by bytes + a generation-aware VMEM limit."""
    try:
        vmem_cap = int(pltpu.get_tpu_info().vmem_capacity_bytes)
    except Exception:
        vmem_cap = 64 << 20  # conservative fallback (v7x-sized VMEM)

    if vmem_cap <= (64 << 20):          # v7x-class: 64 MiB per TensorCore
        x_db_cap, limit_cap = 24 << 20, 40 << 20
    else:                               # v5e / v6e: 128 MiB per TensorCore
        x_db_cap, limit_cap = 40 << 20, 64 << 20

    bytes_per_row = d * x_itemsize
    # Target ~4 MiB per x buffer (2-4 MiB recovers ~85-90% of HBM roofline).
    tm = _round_down_lane((4 << 20) // bytes_per_row)
    # Cap the double-buffered x footprint.
    tm = min(tm, _round_down_lane(x_db_cap // (2 * bytes_per_row)))

    # Full VMEM budget as a function of tm:
    #   2 * tm*d*ix     x (double-buffered)
    #   tm*hid*4        f32 hidden activation (compiler-materialized intermediate)
    #   2*2 * tm*4      (1,tm) mask + output rows (double-buffered)
    # plus (double-buffered) params and a 4 MiB compiler-scratch margin.
    param_bytes = 2 * (d * hid * x_itemsize + (2 * hid + 1) * 4)
    per_row = 2 * bytes_per_row + hid * 4 + 4 * 4
    tile_budget = max(limit_cap - param_bytes - (4 << 20), per_row * _LANE)
    tm = min(tm, _round_down_lane(tile_budget // per_row))

    if tile_m is not None:
        tm = min(tm, _round_down_lane(tile_m))

    if tm >= rows:
        tm = rows
        # Keep >= 2 grid points when there's enough work so both v7x TensorCores
        # are used under dimension_semantics=("parallel",). On 1-TC chips this
        # only costs one extra ~0.35us grid step.
        if rows >= 4 * _LANE:
            tm = _round_down_lane(rows // 2)

    vmem_limit = (2 * tm * bytes_per_row + tm * hid * 4 + 4 * tm * 4
                  + param_bytes + (4 << 20))
    vmem_limit = int(min(max(vmem_limit, 16 << 20), limit_cap))
    return int(tm), vmem_limit


# ------------------------------ jitted core -------------------------------- #
@functools.partial(jax.jit, static_argnames=("tm", "vmem_limit", "stream_bf16"))
def _basenet_call(x, m, w1, b1, w2, b2, *, tm, vmem_limit, stream_bf16):
    n, s, d = x.shape
    hid = w1.shape[1]
    rows = n * s

    # Free reshapes (contiguous views) — fused with the pallas_call under jit.
    x_flat = x.reshape(rows, d)
    m_row = m.reshape(1, rows)

    if stream_bf16:
        # Halve HBM traffic for the dominant stream; accumulation stays f32.
        x_flat = x_flat.astype(jnp.bfloat16)
        w1 = w1.astype(jnp.bfloat16)
    x_itemsize = 2 if stream_bf16 else 4

    grid = (pl.cdiv(rows, tm),)

    cost = pl.CostEstimate(
        flops=2 * rows * d * hid + 2 * rows * hid + rows * hid,
        transcendentals=rows,
        bytes_accessed=(rows * d * x_itemsize            # x stream
                        + 2 * rows * 4                   # mask in + output write
                        + d * hid * x_itemsize           # W1
                        + (2 * hid + 1) * 4),            # b1, W2, b2
    )

    out_row = pl.pallas_call(
        _basenet_kernel,
        out_shape=jax.ShapeDtypeStruct((1, rows), jnp.float32),
        grid_spec=pltpu.PrefetchScalarGridSpec(
            num_scalar_prefetch=0,
            grid=grid,
            in_specs=[
                pl.BlockSpec((tm, d), lambda i: (i, 0)),    # x tile (streams from HBM)
                pl.BlockSpec((1, tm), lambda i: (0, i)),    # mask row (lane-dense)
                pl.BlockSpec((d, hid), lambda i: (0, 0)),   # W1 (constant index -> fetched once)
                pl.BlockSpec((1, hid), lambda i: (0, 0)),   # b1
                pl.BlockSpec((1, hid), lambda i: (0, 0)),   # W2 row (lane-dense)
                pl.BlockSpec((1, 1), lambda i: (0, 0)),     # b2
            ],
            out_specs=pl.BlockSpec((1, tm), lambda i: (0, i)),  # lane-dense stores
        ),
        compiler_params=pltpu.CompilerParams(
            dimension_semantics=("parallel",),
            vmem_limit_bytes=vmem_limit,
        ),
        cost_estimate=cost,
    )(x_flat, m_row, w1, b1, w2, b2)

    return out_row.reshape(rows, 1)      # == out.view(-1, 1)


# ------------------------------ host wrapper ------------------------------ #
def basenet_forward(x, m, w1, b1, w2, b2, *, tile_m=None, stream_bf16=False):
    """Pallas implementation of BaseNet.forward.

    x : (N, S, D) float32   zero-padded bags
    m : (N, S, 1) float32   instance mask
    w1: (D, H)  b1: (1, H)  w2: (1, H)  b2: (1, 1)
    tile_m      optional cap on the row tile (testing / tuning)
    stream_bf16 stream x and W1 as bf16 (f32 accumulation) — numerics change slightly
    returns (None, out) with out : (N*S, 1) float32  (== out.view(-1, 1))
    """
    n, s, d = x.shape
    hid = w1.shape[1]
    rows = n * s
    x_itemsize = 2 if stream_bf16 else 4
    tm, vmem_limit = _plan_tiles(rows, d, hid, x_itemsize, tile_m)
    out = _basenet_call(x, m, w1, b1, w2, b2,
                        tm=tm, vmem_limit=vmem_limit, stream_bf16=bool(stream_bf16))
    return None, out


# ------------------------ deterministic param init ------------------------ #
def init_params(key, d, hidden):
    # PyTorch nn.Linear default: U(-1/sqrt(fan_in), 1/sqrt(fan_in))
    k1, k2, k3, k4 = jax.random.split(key, 4)
    lim1 = 1.0 / jnp.sqrt(jnp.float32(d))
    lim2 = 1.0 / jnp.sqrt(jnp.float32(hidden))
    w1 = jax.random.uniform(k1, (d, hidden), jnp.float32, -lim1, lim1)
    b1 = jax.random.uniform(k2, (1, hidden), jnp.float32, -lim1, lim1)
    w2 = jax.random.uniform(k3, (1, hidden), jnp.float32, -lim2, lim2)  # Linear(H,1).weight
    b2 = jax.random.uniform(k4, (1, 1), jnp.float32, -lim2, lim2)
    return w1, b1, w2, b2


# ----------------------------- pure-JAX reference -------------------------- #
def basenet_forward_ref(x, m, w1, b1, w2, b2):
    n, s, d = x.shape
    xf = x.reshape(n * s, d)
    mf = m.reshape(n * s, 1)
    hf = jnp.maximum(xf @ w1 + b1, 0.0)
    y = mf * (hf @ w2.T + b2)
    return jax.nn.sigmoid(y)


# TODO(synk): training utilities (fit/loss/Yogi optimizer, add_padding, DataLoader)
# are host-side and out of scope for the forward-pass kernel.

if __name__ == "__main__":
    key = jax.random.PRNGKey(0)
    kx, kp, k2 = jax.random.split(key, 3)

    # --- test 1: small shapes matching a typical BaseNet use --------------- #
    N, S, D, H = 2, 8, 32, 32           # bags, bag_size, instance features, hidden
    x = jax.random.normal(kx, (N, S, D), jnp.float32)
    m = jnp.ones((N, S, 1), jnp.float32)
    m = m.at[1, 5:, 0].set(0.0)         # ragged bag: bag 1 has only 5 real instances
    x = x * m                           # zero the padded instances (add_padding())
    w1, b1, w2, b2 = init_params(kp, D, H)

    _, out = basenet_forward(x, m, w1, b1, w2, b2)
    out = jax.block_until_ready(out)
    ref = basenet_forward_ref(x, m, w1, b1, w2, b2)
    assert out.shape == (N * S, 1), out.shape
    assert jnp.allclose(out, ref, atol=1e-5, rtol=1e-5), "mismatch vs reference (test 1)"

    # --- test 2: multi-tile path with a ragged last tile (rows % tile != 0) - #
    N2, S2, D2, H2 = 3, 50, 128, 64     # rows = 150, tile cap 128 -> grid of 2
    ka, kb = jax.random.split(k2)
    x2 = jax.random.normal(ka, (N2, S2, D2), jnp.float32)
    m2 = jnp.ones((N2, S2, 1), jnp.float32)
    m2 = m2.at[0, 40:, 0].set(0.0)
    x2 = x2 * m2
    p2 = init_params(kb, D2, H2)

    _, out2 = basenet_forward(x2, m2, *p2, tile_m=128)
    out2 = jax.block_until_ready(out2)
    ref2 = basenet_forward_ref(x2, m2, *p2)
    assert out2.shape == (N2 * S2, 1), out2.shape
    assert jnp.allclose(out2, ref2, atol=1e-5, rtol=1e-5), "mismatch vs reference (test 2)"

    # --- test 3: bf16-streaming path (optional ~2x HBM traffic reduction) --- #
    _, out3 = basenet_forward(x2, m2, *p2, stream_bf16=True)
    out3 = jax.block_until_ready(out3)
    assert out3.shape == (N2 * S2, 1), out3.shape
    assert jnp.allclose(out3, ref2, atol=2e-2, rtol=0.0), "mismatch vs reference (test 3, bf16)"

    print("KERNEL_OK")
</pallas_src>

<mosaic_0001>
module attributes {stable_mosaic.version = 11 : i64} {
  func.func @_basenet_kernel(%arg0: i32, %arg1: memref<16x32xf32, #tpu.memory_space<vmem>>, %arg2: memref<1x16xf32, #tpu.memory_space<vmem>>, %arg3: memref<32x32xf32, #tpu.memory_space<vmem>>, %arg4: memref<1x32xf32, #tpu.memory_space<vmem>>, %arg5: memref<1x32xf32, #tpu.memory_space<vmem>>, %arg6: memref<1x1xf32, #tpu.memory_space<vmem>>, %arg7: memref<1x16xf32, #tpu.memory_space<vmem>>) attributes {dimension_semantics = [#tpu.dimension_semantics<parallel>], iteration_bounds = array<i64: 1>, scalar_prefetch = 0 : i64, scratch_operands = 0 : i64, tpu.core_type = #tpu.core_type<tc>, window_params = [{transform_indices = @transform_0, window_bounds = array<i64: 16, 32>}, {transform_indices = @transform_1, window_bounds = array<i64: 1, 16>}, {pipeline_mode = #tpu.pipeline_mode<synchronous>, transform_indices = @transform_2, window_bounds = array<i64: 32, 32>}, {pipeline_mode = #tpu.pipeline_mode<synchronous>, transform_indices = @transform_3, window_bounds = array<i64: 1, 32>}, {pipeline_mode = #tpu.pipeline_mode<synchronous>, transform_indices = @transform_4, window_bounds = array<i64: 1, 32>}, {pipeline_mode = #tpu.pipeline_mode<synchronous>, transform_indices = @transform_5, window_bounds = array<i64: 1, 1>}, {transform_indices = @transform_6, window_bounds = array<i64: 1, 16>}]} {
    %c0 = arith.constant 0 : index
    %c0_0 = arith.constant 0 : index
    %0 = vector.load %arg1[%c0, %c0_0] : memref<16x32xf32, #tpu.memory_space<vmem>>, vector<16x32xf32>
    %c0_1 = arith.constant 0 : index
    %c0_2 = arith.constant 0 : index
    %1 = vector.load %arg3[%c0_1, %c0_2] : memref<32x32xf32, #tpu.memory_space<vmem>>, vector<32x32xf32>
    %cst = arith.constant dense<0.000000e+00> : vector<16x32xf32>
    %2 = tpu.matmul %0, %1, %cst {dimension_numbers = #tpu.dot_dimension_numbers<[1], [0], [0], [1], [0, 0, 1, 1], [], []>} : vector<16x32xf32>, vector<32x32xf32>, vector<16x32xf32> -> vector<16x32xf32>
    %c0_3 = arith.constant 0 : index
    %c0_4 = arith.constant 0 : index
    %3 = vector.load %arg4[%c0_3, %c0_4] : memref<1x32xf32, #tpu.memory_space<vmem>>, vector<1x32xf32>
    %4 = vector.broadcast %3 : vector<1x32xf32> to vector<16x32xf32>
    %5 = arith.addf %2, %4 : vector<16x32xf32>
    %cst_5 = arith.constant 0.000000e+00 : f32
    %6 = vector.broadcast %cst_5 : f32 to vector<16x32xf32>
    %7 = arith.maximumf %5, %6 : vector<16x32xf32>
    %c0_6 = arith.constant 0 : index
    %c0_7 = arith.constant 0 : index
    %8 = vector.load %arg5[%c0_6, %c0_7] : memref<1x32xf32, #tpu.memory_space<vmem>>, vector<1x32xf32>
    %cst_8 = arith.constant dense<0.000000e+00> : vector<1x16xf32>
    %9 = tpu.matmul %8, %7, %cst_8 {dimension_numbers = #tpu.dot_dimension_numbers<[1], [1], [0], [0], [0, 0, 1, 0], [], []>} : vector<1x32xf32>, vector<16x32xf32>, vector<1x16xf32> -> vector<1x16xf32>
    %c0_9 = arith.constant 0 : index
    %c0_10 = arith.constant 0 : index
    %10 = vector.load %arg6[%c0_9, %c0_10] : memref<1x1xf32, #tpu.memory_space<vmem>>, vector<1x1xf32>
    %11 = vector.broadcast %10 : vector<1x1xf32> to vector<1x16xf32>
    %12 = arith.addf %9, %11 : vector<1x16xf32>
    %c0_11 = arith.constant 0 : index
    %c0_12 = arith.constant 0 : index
    %13 = vector.load %arg2[%c0_11, %c0_12] : memref<1x16xf32, #tpu.memory_space<vmem>>, vector<1x16xf32>
    %14 = arith.mulf %13, %12 : vector<1x16xf32>
    %15 = arith.negf %14 : vector<1x16xf32>
    %16 = math.exp %15 : vector<1x16xf32>
    %cst_13 = arith.constant 1.000000e+00 : f32
    %17 = vector.broadcast %cst_13 : f32 to vector<1x16xf32>
    %18 = arith.addf %17, %16 : vector<1x16xf32>
    %19 = arith.divf %17, %18 : vector<1x16xf32>
    %c0_14 = arith.constant 0 : index
    %c0_15 = arith.constant 0 : index
    %20 = vector.load %arg7[%c0_14, %c0_15] : memref<1x16xf32, #tpu.memory_space<vmem>>, vector<1x16xf32>
    tpu.vector_store %arg7[%c0_14, %c0_15], %19 {strides = array<i32>} : memref<1x16xf32, #tpu.memory_space<vmem>>, vector<1x16xf32>,
    return
  }
  func.func @transform_0(%arg0: i32) -> (i32, i32) {
    %c0_i32 = arith.constant 0 : i32
    %c0_i32_0 = arith.constant 0 : i32
    return %arg0, %c0_i32 : i32, i32
  }
  func.func @transform_1(%arg0: i32) -> (i32, i32) {
    %c0_i32 = arith.constant 0 : i32
    %c0_i32_0 = arith.constant 0 : i32
    return %c0_i32, %arg0 : i32, i32
  }
  func.func @transform_2(%arg0: i32) -> (i32, i32) {
    %c0_i32 = arith.constant 0 : i32
    %c0_i32_0 = arith.constant 0 : i32
    %c0_i32_1 = arith.constant 0 : i32
    return %c0_i32, %c0_i32_0 : i32, i32
  }
  func.func @transform_3(%arg0: i32) -> (i32, i32) {
    %c0_i32 = arith.constant 0 : i32
    %c0_i32_0 = arith.constant 0 : i32
    %c0_i32_1 = arith.constant 0 : i32
    return %c0_i32, %c0_i32_0 : i32, i32
  }
  func.func @transform_4(%arg0: i32) -> (i32, i32) {
    %c0_i32 = arith.constant 0 : i32
    %c0_i32_0 = arith.constant 0 : i32
    %c0_i32_1 = arith.constant 0 : i32
    return %c0_i32, %c0_i32_0 : i32, i32
  }
  func.func @transform_5(%arg0: i32) -> (i32, i32) {
    %c0_i32 = arith.constant 0 : i32
    %c0_i32_0 = arith.constant 0 : i32
    %c0_i32_1 = arith.constant 0 : i32
    return %c0_i32, %c0_i32_0 : i32, i32
  }
  func.func @transform_6(%arg0: i32) -> (i32, i32) {
    %c0_i32 = arith.constant 0 : i32
    %c0_i32_0 = arith.constant 0 : i32
    return %c0_i32, %arg0 : i32, i32
  }
}

</mosaic_0001>

<bundles_post_ra>
// kernel: _basenet_call.1
= control target key start
LH: loop header
LB: loop body
LE: loop exit
PB: predicated region body
PF: predicated region fallthrough
CT: control target
= control target key end

     0   :  { %s449_s0 = inlined_call_operand.vmem [shape: f32[16,32], index: 0, kind: input, shape index: {}]   ;;  %s450_s1 = inlined_call_operand.vmem [shape: f32[1,16], index: 1, kind: input, shape index: {}]   ;;  %s451_s2 = inlined_call_operand.hbm [shape: f32[32,32], index: 2, kind: input, shape index: {}]   ;;  %s452_s3 = inlined_call_operand.vmem [shape: f32[1,32], index: 3, kind: input, shape index: {}]   ;;  %s453_s4 = inlined_call_operand.vmem [shape: f32[1,32], index: 4, kind: input, shape index: {}]   ;;  %s454_s5 = inlined_call_operand.<no memory space> [shape: f32[1,1], index: 5, kind: input, shape index: {}]   ;;  %s455_s6 = inlined_call_operand.hbm [shape: f32[1,16], index: 6, kind: output, shape index: {}]  }
   0x1   :  { %v11_v0 = vstv %s454_s5 }
   0x2   :  { %12 = vst [vmem:[#allocation2] sm:$0x1] %v11_v0 }
   0x3   :  { %13 = vsyncpa [#allocation4], 0 }
   0x4   :  { %14 = vsyncpa [#allocation5], 0  ;;  %s359_s23 = smov [#allocation3]   ;;  %s311_s27 = scalar_lea.hbm %s451_s2, 512 }
   0x5   :  { %s24_s24 = sshll.u32 %s359_s23, 4  ;;  %p312_p0 = scmp.ne.s32.totalorder %s451_s2, %s311_s27  ;;  %s25_s24 = int_to_ptr.vmem [resolvable:$true] %s24_s24 }
   0x6   :  { %p315_p1 = scmp.lt.u32.totalorder %s311_s27, %s451_s2 }
   0x8   :  { %p317_p2 = pnand %p315_p1, %p312_p0 }
   0xa   :  { %320 = shalt.err (!%p317_p2)
}
   0xb   :  { %s321_s5 = scalar_lea.vmem %s25_s24, 512  ;;  %p326_p4 = scmp.lt.s32.totalorder %s25_s24, %s25_s24 }
   0xc   :  { %p322_p3 = scmp.ne.s32.totalorder %s25_s24, %s321_s5  ;;  %p327_p5 = scmp.lt.s32.totalorder %s321_s5, %s321_s5 }
   0xe   :  { %p328_p6 = por %p327_p5, %p326_p4 }
  0x10   :  { %p329_p7 = pnand %p328_p6, %p322_p3 }
  0x12   :  { %332 = shalt.err (!%p329_p7)
}
  0x13   :  { %s360_s8 = smov 128   ;;  %s361_s9 = smov 8  }
  0x14   :  { %30 = dma.hbm_to_vmem [thread:$0]  %s451_s2, 512, %s25_s24, [#allocation4], %s360_s8, %s360_s8, %s361_s9  }
  0x15   :  { %355 = dma.done.wait [#allocation4], 512  }
  0x16   :  { %356 = vsyncadd [#allocation4], 4294966784  ;;  %vm53_vm0 = vcmask 261120   ;;  %v42_v1 = vld [vmem:[#allocation3] sm:$0xff]  ;;  %v43_v2 = vld [vmem:[#allocation3 + $0x8] sm:$0xff]  ;;  %v362_v9 = vmov 0.0|0.0   ;;  %v144_v22 = vlaneseq }
  0x17   :  { %v44_v3 = vld [vmem:[#allocation3 + $0x10] sm:$0xff]  ;;  %v286_v4 = vpack.c.bf16 %v43_v2, %v42_v1  ;;  %v45_v5 = vld [vmem:[#allocation3 + $0x18] sm:$0xff]  ;;  %v41_v8 = vld [vmem:[%s449_s0 + $0x8] sm:$0xff]  ;;  %294 = vmatprep.subr.bf16.mxu1 %v362_v9  ;;  %vm363_vm1 = vmmov 0   ;;  %v364_v10 = vmov 0.0   ;;  %v365_v12 = vmov 0  }
  0x18   :  { %v40_v6 = vld [vmem:[%s449_s0] sm:$0xff]  ;;  %v290_v7 = vpack.c.bf16 %v45_v5, %v44_v3  ;;  %283 = vmatprep.mubr.msk.f32.mxu1 %vm363_vm1, %v364_v10  ;;  %306 = vset.pattern.permute.xlu0 %v365_v12  ;;  %vm296_vm2 = vmpackc.low %vm53_vm0, %vm53_vm0  ;;  %v145_v23 = vshrl.u32 %v144_v22, 7  ;;  %vm235_vm3 = vcmask 122880  }
  0x19   :  { %276 = vmatprep.mubr.msk.f32.mxu0 %vm53_vm0, %v40_v6  ;;  %287 = vmatprep.subr.bf16.mxu0 %v286_v4  ;;  %v138_v11 = vld [vmem:[#allocation2] sm:$0x1] }
  0x1a   :  { %289 = vmatpush3.bf16.msra.mxu0 %v286_v4  ;;  %141 = vperm.xlu0 %306, %v138_v11   ;;  %v252_v13 = vld [vmem:[%s452_s3] ss:$0 sm:$0xff]  ;;  %v146_v24 = vsub.s32 0, %v145_v23 }
  0x1b   :  { %291 = vmatprep.subr.bf16.mxu0 %v290_v7  ;;  %v137_v21 = vld [vmem:[%s453_s4] sm:$0x1]  ;;  %s366_s4 = smov [#allocation6]  }
  0x1c   :  { %v227_v28 = vld [vmem:[%s450_s1] sm:$0x1]  ;;  %s243_s19 = sshll.u32 %s366_s4, 4  ;;  %s244_s19 = int_to_ptr.vmem [resolvable:$true] %s243_s19 }
  0x1d   :  { %s333_s20 = scalar_lea.vmem %s244_s19, 16  ;;  %s337_s21 = scalar_lea.vmem %s244_s19, 32 }
  0x1e   :  { %293 = vmatpush3.bf16.msra.mxu0 %v290_v7  ;;  %p334_p8 = scmp.ne.s32.totalorder %s244_s19, %s333_s20  ;;  %p338_p9 = scmp.lt.s32.totalorder %s244_s19, %s244_s19 }
  0x1f   :  { %p339_p10 = scmp.lt.s32.totalorder %s337_s21, %s333_s20 }
  0x21   :  { %277 = vmatmul.mubr.msk.f32.vlgmr.msra.gmra.mrb[0].mxu0 %vm53_vm0, %v41_v8  ;;  %p340_p11 = por %p339_p10, %p338_p9 }
  0x23   :  { %p341_p12 = pnand %p340_p11, %p334_p8 }
  0x99   :  { %v142_v25 = vpop.permute.xlu0 %141 }
  0x9a   :  { %v147_v26 = vrot.slane %v142_v25, %v146_v24 }
  0xf4   :  { %v278_v14 = vpop.f32.mrb[0].mxu0 }
  0xf5   :  { %v132_v15 = vadd.f32 %v278_v14, %v252_v13  ;;  %v126_v16 = vpop.f32.mrb[1].mxu0 }
  0xf6   :  { %v127_v17 = vadd.f32 %v252_v13, %v126_v16 }
  0xf7   :  { %v136_v18 = vmax.f32 %v132_v15, 0.0 }
  0xf8   :  { %v135_v19 = vmax.f32 %v127_v17, 0.0 }
  0xfa   :  { %v295_v20 = vpack.c.bf16 %v136_v18, %v135_v19 }
  0xfc   :  { %297 = vmatpush3.bf16.xpose.msk.msra.mxu1 %vm296_vm2, %v295_v20 }
 0x103   :  { %284 = vmatmul.mubr.msk.f32.vlgmr.msra.gmra.mrb[0].mxu1 %vm53_vm0, %v137_v21 }
 0x1d6   :  { %v223_v27 = vpop.f32.mrb[0].mxu1 }
 0x1d7   :  { %v224_v29 = vadd.f32 %v223_v27, %v147_v26  ;;  %v285_v30 = vpop.f32.mrb[1].mxu1 }
 0x1d9   :  { %v228_v31 = vmul.f32 %v227_v28, %v224_v29 }
 0x1db   :  { %v258_v32 = vmul.f32 -1.442695, %v228_v31 }
 0x1dd   :  { %307 = vpow2.f32 %v258_v32 }
 0x1e7   :  { %v308_v33 = vpop.eup %307 }
 0x1e8   :  { %v232_v34 = vadd.f32 1.0, %v308_v33 }
 0x1ea   :  { %309 = vrcp.f32 %v232_v34 }
 0x1f4   :  { %v310_v35 = vpop.eup %309 }
 0x1f5   :  { %236 = vst.msk [vmem:[#allocation6] sm:$0x1] %vm235_vm3, %v310_v35 }
 0x1f6   :  { %344 = shalt.err (!%p341_p12)
}
 0x1f7   :  { %s345_s23 = scalar_lea.hbm %s455_s6, 16 }
 0x1f8   :  { %p346_p13 = scmp.ne.s32.totalorder %s455_s6, %s345_s23  ;;  %p349_p0 = scmp.lt.u32.totalorder %s345_s23, %s455_s6 }
 0x1fa   :  { %p351_p1 = pnand %p349_p0, %p346_p13 }
 0x1fc   :  { %354 = shalt.err (!%p351_p1)
}
 0x1fd   :  { %246 = dma.vmem_to_hbm [thread:$0]  %s244_s19, 16, %s455_s6, [#allocation5]  }
 0x1fe   :  { %357 = dma.done.wait [#allocation5], 16  }
 0x1ff   :  { %358 = vsyncadd [#allocation5], 4294967280 }
 0x200   :  { %250 = vsyncpa [#allocation4], 1 }
 0x201   :  { %251 = vsyncpa [#allocation5], 1 }

</bundles_post_ra>
